<compile_context>
chip_gen: v7x
topology: tpu7x:2x2x1
jax: 0.10.0
libtpu: 0.0.40
codegen_flags: <defaults>
</compile_context>

<pallas_src>
import functools

import numpy as np
import jax
import jax.numpy as jnp
from jax.experimental import pallas as pl
from jax.experimental.pallas import tpu as pltpu

LANE = 128  # lane-aligned zero prefix for the time-axis scratch


def _round_up(x, m):
    return (x + m - 1) // m * m


def _fused_loss_kernel(price_ref, weight_ref, bench_ref, out_ref, r_sc,
                       *, T, Tp, W, A, cost, sigma_scale, corr_cost, loss_mul):
    f32 = jnp.float32

    # ---------------- asset returns (time on lanes): r[t]=p[t]/p[t-1]-1, r[0]=0 ----
    # r[t] lives at scratch lane (LANE-1+t).  Lanes [0, LANE) are a zero prefix so
    # r[0]=0 comes from the pad and BOTH scratch stores stay 128-lane aligned;
    # only the window reads use shifted lane offsets.
    p_cur = price_ref[:, pl.ds(1, T - 1)].astype(f32)     # p[1:T]
    p_prev = price_ref[:, pl.ds(0, T - 1)].astype(f32)    # p[0:T-1]
    r_sc[:, pl.ds(0, LANE)] = jnp.zeros((A, LANE), f32)
    r_sc[:, pl.ds(LANE, T - 1)] = p_cur / p_prev - 1.0

    # ---------------- rolling variance: SINGLE pass, shifted-data form --------------
    # Shift each window by its own first element x0: ssd = sum(y^2) - (sum y)^2 / W,
    # var = ssd / (W-1).  (d=0 contributes y=0, so it is skipped.)
    x0 = r_sc[:, pl.ds(LANE - 1, Tp)]                     # d = 0 slab, (A, Tp)
    r_align = r_sc[:, pl.ds(LANE - 2 + W, Tp)]            # d = W-1 slab, reused below
    s1 = jnp.zeros((A, Tp), f32)
    s2 = jnp.zeros((A, Tp), f32)
    for d in range(1, W - 1):                             # W-2 shifted reads (VPU)
        y = r_sc[:, pl.ds(LANE - 1 + d, Tp)] - x0
        s1 = s1 + y
        s2 = s2 + y * y
    y = r_align - x0                                      # hoisted last slab
    s1 = s1 + y
    s2 = s2 + y * y
    ssd = s2 - s1 * s1 * (1.0 / W)                        # sum of squared deviations
    sigma = jnp.sqrt(ssd * (1.0 / (W - 1)))               # rolling std, ddof=1

    # ---------------- vol targeting (EUP reciprocal), turnover, portfolio return ----
    w = weight_ref[...].astype(f32)                       # (A, Tp)
    w_adj = w * (sigma_scale * pl.reciprocal(sigma + 1e-8, approx=True))

    # One-step lag of w_adj: reuse the (already fully consumed) return scratch.
    # Lane LANE-1 is still zero from the prefix -> w_prev[:,0] = 0.
    r_sc[:, pl.ds(LANE, Tp)] = w_adj                      # aligned store
    w_prev = r_sc[:, pl.ds(LANE - 1, Tp)]                 # shifted read

    port = jnp.sum(w_adj * r_align, axis=0, keepdims=True)                    # (1,Tp)
    tcost = cost * jnp.sum(jnp.abs(w_adj - w_prev), axis=0, keepdims=True)    # (1,Tp)
    ret = port - tcost                                    # stays in vregs, never hits HBM

    # ---------------- loss terms ----------------------------------------------------
    nf = float(Tp)
    mean_r = jnp.sum(ret) / nf
    dr = ret - mean_r
    sum_dr2 = jnp.sum(dr * dr)
    std_r = jnp.sqrt(sum_dr2 / (nf - 1.0))                # torch.std (unbiased)
    loss1 = -mean_r / std_r                               # TODO(synk): no eps guard, matches reference

    b = bench_ref[...].astype(f32)                        # (1, Tp), sliced on host
    mean_b = jnp.sum(b) / nf
    db = b - mean_b
    corr = jnp.abs(jnp.sum(dr * db)) / jnp.sqrt(sum_dr2 * jnp.sum(db * db))
    loss2 = corr_cost * corr

    col_dev = jnp.abs(jnp.sum(w, axis=0, keepdims=True) - 1.0)
    loss3 = loss_mul * jnp.sum(col_dev)

    out_ref[0, 0] = (loss1 + loss2 + loss3).astype(jnp.float32)


class ReturnLossNewPallas:
    """Pallas TPU implementation of ReturnLoss_new.forward."""

    def __init__(self, num_asset, price, cost, benchmark, corr_cost,
                 span=63, window_size=21, sigma_scale=0.15):
        self.num_asset = num_asset
        price = jnp.asarray(price, jnp.float32)            # (T, A)
        benchmark = jnp.asarray(benchmark, jnp.float32)    # (T, 1)
        self.T, self.A = price.shape
        self.window_size = int(window_size)
        assert self.window_size >= 2 and self.T >= self.window_size
        assert benchmark.shape[0] == self.T
        self.Tp = self.T - self.window_size + 1
        # Lane-dense layout: time on the last (lane) axis; benchmark pre-sliced.
        self.price_t = price.T                                      # (A, T)
        self.bench_t = benchmark[self.window_size - 1:].T           # (1, Tp)
        self.cost = float(cost)
        self.corr_cost = float(corr_cost)
        self.span = span            # unused (see TODO at top of file)
        self.sigma_scale = float(sigma_scale)

    def __call__(self, weight_df, loss_mul=1.0):
        weight_t = jnp.asarray(weight_df, jnp.float32).T            # (A, Tp)
        T, A, W, Tp = self.T, self.A, self.window_size, self.Tp
        assert weight_t.shape == (A, Tp)

        kernel = functools.partial(
            _fused_loss_kernel, T=T, Tp=Tp, W=W, A=A,
            cost=self.cost, sigma_scale=self.sigma_scale,
            corr_cost=self.corr_cost, loss_mul=float(loss_mul))

        # scoped-VMEM budget sized from the (transposed) footprint, f32 (8,128) tiles
        def tile_bytes(r, c):
            return 4 * _round_up(r, 8) * _round_up(c, 128)
        est = (tile_bytes(A, T) + tile_bytes(A, Tp) + tile_bytes(1, Tp)
               + tile_bytes(A, LANE + T - 1))
        vmem_bytes = int(min(max(4 * est + (1 << 20), 32 << 20), 60 << 20))
        # TODO(synk): for very large T, switch to a 1-D time-blocked grid with a
        # W-1 halo and carried moment accumulators (v7x 64 MiB VMEM / 2nd TC).

        loss = pl.pallas_call(
            kernel,
            out_shape=jax.ShapeDtypeStruct((1, 1), jnp.float32),
            in_specs=[pl.BlockSpec(memory_space=pltpu.MemorySpace.VMEM),
                      pl.BlockSpec(memory_space=pltpu.MemorySpace.VMEM),
                      pl.BlockSpec(memory_space=pltpu.MemorySpace.VMEM)],
            out_specs=pl.BlockSpec(memory_space=pltpu.MemorySpace.SMEM),
            scratch_shapes=[pltpu.VMEM((A, LANE + T - 1), jnp.float32)],
            compiler_params=pltpu.CompilerParams(vmem_limit_bytes=vmem_bytes),
        )(self.price_t, weight_t, self.bench_t)
        return loss[0, 0]


# ------------------------------------------------------------------------------------
# Pure-JAX reference mirroring the PyTorch ReturnLoss_new.forward semantics
# ------------------------------------------------------------------------------------
def reference_loss(price, weight, benchmark, cost, corr_cost, W, sigma_scale, loss_mul=1.0):
    T, A = price.shape
    Tp = T - W + 1
    r = jnp.concatenate([jnp.zeros((1, A), jnp.float32), price[1:] / price[:-1] - 1.0], axis=0)
    windows = jnp.stack([r[i:i + W] for i in range(Tp)], axis=0)          # (Tp, W, A)
    sigma = jnp.std(windows, axis=1, ddof=1)
    w_adj = weight * sigma_scale / (sigma + 1e-8)
    r_align = r[W - 1:]
    w_prev = jnp.concatenate([jnp.zeros((1, A), jnp.float32), w_adj[:-1]], axis=0)
    ret = jnp.sum(w_adj * r_align, axis=1) - cost * jnp.sum(jnp.abs(w_adj - w_prev), axis=1)
    b = benchmark[W - 1:, 0]
    loss1 = -ret.mean() / jnp.std(ret, ddof=1)
    corr = jnp.abs(jnp.corrcoef(jnp.stack([ret, b]))[0, 1])
    loss2 = corr_cost * corr
    loss3 = loss_mul * jnp.sum(jnp.abs(weight.sum(axis=1) - 1.0))
    return loss1 + loss2 + loss3


if __name__ == "__main__":
    T, A, W = 23, 4, 8            # small shapes: 23 price rows, 4 assets, 8-day window
    Tp = T - W + 1                # 16 portfolio-return steps

    key = jax.random.PRNGKey(0)
    k1, k2, k3 = jax.random.split(key, 3)
    price = 100.0 * jnp.cumprod(1.0 + 0.01 * jax.random.normal(k1, (T, A), jnp.float32), axis=0)
    weight_df = 0.5 * jax.random.uniform(k2, (Tp, A), jnp.float32)        # rows sum ~ 1
    benchmark = 0.01 * jax.random.normal(k3, (T, 1), jnp.float32)

    module = ReturnLossNewPallas(num_asset=A, price=price, cost=1e-3,
                                 benchmark=benchmark, corr_cost=0.5,
                                 span=16, window_size=W, sigma_scale=0.15)

    loss = module(weight_df)
    loss = jax.block_until_ready(loss)

    ref = reference_loss(price, weight_df, benchmark, 1e-3, 0.5, W, 0.15)
    np.testing.assert_allclose(np.asarray(loss), np.asarray(ref), rtol=1e-2, atol=1e-2)

    print("KERNEL_OK")
</pallas_src>

<mosaic_0001>
module attributes {stable_mosaic.version = 11 : i64} {
  func.func @_fused_loss_kernel(%arg0: memref<4x23xf32, #tpu.memory_space<vmem>>, %arg1: memref<4x16xf32, #tpu.memory_space<vmem>>, %arg2: memref<1x16xf32, #tpu.memory_space<vmem>>, %arg3: memref<1x1xf32, #tpu.memory_space<smem>>, %arg4: memref<4x150xf32, #tpu.memory_space<vmem>>) attributes {dimension_semantics = [], scalar_prefetch = 0 : i64, scratch_operands = 1 : i64, tpu.core_type = #tpu.core_type<tc>} {
    %c0 = arith.constant 0 : index
    %c1 = arith.constant 1 : index
    %0 = vector.load %arg0[%c0, %c1] : memref<4x23xf32, #tpu.memory_space<vmem>>, vector<4x22xf32>
    %c0_0 = arith.constant 0 : index
    %c0_1 = arith.constant 0 : index
    %1 = vector.load %arg0[%c0_0, %c0_1] : memref<4x23xf32, #tpu.memory_space<vmem>>, vector<4x22xf32>
    %cst = arith.constant 0.000000e+00 : f32
    %2 = vector.broadcast %cst : f32 to vector<4x128xf32>
    %c0_2 = arith.constant 0 : index
    %c0_3 = arith.constant 0 : index
    %3 = vector.load %arg4[%c0_2, %c0_3] : memref<4x150xf32, #tpu.memory_space<vmem>>, vector<4x128xf32>
    tpu.vector_store %arg4[%c0_2, %c0_3], %2 {strides = array<i32>} : memref<4x150xf32, #tpu.memory_space<vmem>>, vector<4x128xf32>,
    %4 = arith.divf %0, %1 : vector<4x22xf32>
    %cst_4 = arith.constant 1.000000e+00 : f32
    %5 = vector.broadcast %cst_4 : f32 to vector<4x22xf32>
    %6 = arith.subf %4, %5 : vector<4x22xf32>
    %c0_5 = arith.constant 0 : index
    %c128 = arith.constant 128 : index
    %7 = vector.load %arg4[%c0_5, %c128] : memref<4x150xf32, #tpu.memory_space<vmem>>, vector<4x22xf32>
    tpu.vector_store %arg4[%c0_5, %c128], %6 {strides = array<i32>} : memref<4x150xf32, #tpu.memory_space<vmem>>, vector<4x22xf32>,
    %c0_6 = arith.constant 0 : index
    %c127 = arith.constant 127 : index
    %8 = vector.load %arg4[%c0_6, %c127] : memref<4x150xf32, #tpu.memory_space<vmem>>, vector<4x16xf32>
    %c0_7 = arith.constant 0 : index
    %c134 = arith.constant 134 : index
    %9 = vector.load %arg4[%c0_7, %c134] : memref<4x150xf32, #tpu.memory_space<vmem>>, vector<4x16xf32>
    %cst_8 = arith.constant 0.000000e+00 : f32
    %10 = vector.broadcast %cst_8 : f32 to vector<4x16xf32>
    %cst_9 = arith.constant 0.000000e+00 : f32
    %11 = vector.broadcast %cst_9 : f32 to vector<4x16xf32>
    %c0_10 = arith.constant 0 : index
    %c128_11 = arith.constant 128 : index
    %12 = vector.load %arg4[%c0_10, %c128_11] : memref<4x150xf32, #tpu.memory_space<vmem>>, vector<4x16xf32>
    %13 = arith.subf %12, %8 : vector<4x16xf32>
    %14 = arith.addf %10, %13 : vector<4x16xf32>
    %15 = arith.mulf %13, %13 : vector<4x16xf32>
    %16 = arith.addf %11, %15 : vector<4x16xf32>
    %c0_12 = arith.constant 0 : index
    %c129 = arith.constant 129 : index
    %17 = vector.load %arg4[%c0_12, %c129] : memref<4x150xf32, #tpu.memory_space<vmem>>, vector<4x16xf32>
    %18 = arith.subf %17, %8 : vector<4x16xf32>
    %19 = arith.addf %14, %18 : vector<4x16xf32>
    %20 = arith.mulf %18, %18 : vector<4x16xf32>
    %21 = arith.addf %16, %20 : vector<4x16xf32>
    %c0_13 = arith.constant 0 : index
    %c130 = arith.constant 130 : index
    %22 = vector.load %arg4[%c0_13, %c130] : memref<4x150xf32, #tpu.memory_space<vmem>>, vector<4x16xf32>
    %23 = arith.subf %22, %8 : vector<4x16xf32>
    %24 = arith.addf %19, %23 : vector<4x16xf32>
    %25 = arith.mulf %23, %23 : vector<4x16xf32>
    %26 = arith.addf %21, %25 : vector<4x16xf32>
    %c0_14 = arith.constant 0 : index
    %c131 = arith.constant 131 : index
    %27 = vector.load %arg4[%c0_14, %c131] : memref<4x150xf32, #tpu.memory_space<vmem>>, vector<4x16xf32>
    %28 = arith.subf %27, %8 : vector<4x16xf32>
    %29 = arith.addf %24, %28 : vector<4x16xf32>
    %30 = arith.mulf %28, %28 : vector<4x16xf32>
    %31 = arith.addf %26, %30 : vector<4x16xf32>
    %c0_15 = arith.constant 0 : index
    %c132 = arith.constant 132 : index
    %32 = vector.load %arg4[%c0_15, %c132] : memref<4x150xf32, #tpu.memory_space<vmem>>, vector<4x16xf32>
    %33 = arith.subf %32, %8 : vector<4x16xf32>
    %34 = arith.addf %29, %33 : vector<4x16xf32>
    %35 = arith.mulf %33, %33 : vector<4x16xf32>
    %36 = arith.addf %31, %35 : vector<4x16xf32>
    %c0_16 = arith.constant 0 : index
    %c133 = arith.constant 133 : index
    %37 = vector.load %arg4[%c0_16, %c133] : memref<4x150xf32, #tpu.memory_space<vmem>>, vector<4x16xf32>
    %38 = arith.subf %37, %8 : vector<4x16xf32>
    %39 = arith.addf %34, %38 : vector<4x16xf32>
    %40 = arith.mulf %38, %38 : vector<4x16xf32>
    %41 = arith.addf %36, %40 : vector<4x16xf32>
    %42 = arith.subf %9, %8 : vector<4x16xf32>
    %43 = arith.addf %39, %42 : vector<4x16xf32>
    %44 = arith.mulf %42, %42 : vector<4x16xf32>
    %45 = arith.addf %41, %44 : vector<4x16xf32>
    %46 = arith.mulf %43, %43 : vector<4x16xf32>
    %cst_17 = arith.constant 1.250000e-01 : f32
    %47 = vector.broadcast %cst_17 : f32 to vector<4x16xf32>
    %48 = arith.mulf %46, %47 : vector<4x16xf32>
    %49 = arith.subf %45, %48 : vector<4x16xf32>
    %cst_18 = arith.constant 0.142857149 : f32
    %50 = vector.broadcast %cst_18 : f32 to vector<4x16xf32>
    %51 = arith.mulf %49, %50 : vector<4x16xf32>
    %52 = math.sqrt %51 : vector<4x16xf32>
    %c0_19 = arith.constant 0 : index
    %c0_20 = arith.constant 0 : index
    %53 = vector.load %arg1[%c0_19, %c0_20] : memref<4x16xf32, #tpu.memory_space<vmem>>, vector<4x16xf32>
    %cst_21 = arith.constant 9.99999993E-9 : f32
    %54 = vector.broadcast %cst_21 : f32 to vector<4x16xf32>
    %55 = arith.addf %52, %54 : vector<4x16xf32>
    %56 = tpu.reciprocal %55 {approx = true} : vector<4x16xf32> -> vector<4x16xf32>
    %cst_22 = arith.constant 1.500000e-01 : f32
    %57 = vector.broadcast %cst_22 : f32 to vector<4x16xf32>
    %58 = arith.mulf %57, %56 : vector<4x16xf32>
    %59 = arith.mulf %53, %58 : vector<4x16xf32>
    %c0_23 = arith.constant 0 : index
    %c128_24 = arith.constant 128 : index
    %60 = vector.load %arg4[%c0_23, %c128_24] : memref<4x150xf32, #tpu.memory_space<vmem>>, vector<4x16xf32>
    tpu.vector_store %arg4[%c0_23, %c128_24], %59 {strides = array<i32>} : memref<4x150xf32, #tpu.memory_space<vmem>>, vector<4x16xf32>,
    %c0_25 = arith.constant 0 : index
    %c127_26 = arith.constant 127 : index
    %61 = vector.load %arg4[%c0_25, %c127_26] : memref<4x150xf32, #tpu.memory_space<vmem>>, vector<4x16xf32>
    %62 = arith.mulf %59, %9 : vector<4x16xf32>
    %cst_27 = arith.constant dense<0.000000e+00> : vector<16xf32>
    %63 = vector.multi_reduction <add>, %62, %cst_27 [0] : vector<4x16xf32> to vector<16xf32>
    %64 = vector.shape_cast %63 : vector<16xf32> to vector<1x16xf32>
    %65 = arith.subf %59, %61 : vector<4x16xf32>
    %66 = math.absf %65 : vector<4x16xf32>
    %cst_28 = arith.constant dense<0.000000e+00> : vector<16xf32>
    %67 = vector.multi_reduction <add>, %66, %cst_28 [0] : vector<4x16xf32> to vector<16xf32>
    %68 = vector.shape_cast %67 : vector<16xf32> to vector<1x16xf32>
    %cst_29 = arith.constant 1.000000e-03 : f32
    %69 = vector.broadcast %cst_29 : f32 to vector<1x16xf32>
    %70 = arith.mulf %69, %68 : vector<1x16xf32>
    %71 = arith.subf %64, %70 : vector<1x16xf32>
    %72 = vector.shape_cast %71 : vector<1x16xf32> to vector<1x1x16xf32>
    %cst_30 = arith.constant dense<0.000000e+00> : vector<1xf32>
    %73 = vector.multi_reduction <add>, %72, %cst_30 [1, 2] : vector<1x1x16xf32> to vector<1xf32>
    %74 = vector.shape_cast %73 : vector<1xf32> to vector<1x1x1xf32>
    %75 = vector.extract %74[0, 0, 0] : f32 from vector<1x1x1xf32>
    %cst_31 = arith.constant 1.600000e+01 : f32
    %76 = arith.divf %75, %cst_31 : f32
    %77 = vector.broadcast %76 : f32 to vector<1x16xf32>
    %78 = arith.subf %71, %77 : vector<1x16xf32>
    %79 = arith.mulf %78, %78 : vector<1x16xf32>
    %80 = vector.shape_cast %79 : vector<1x16xf32> to vector<1x1x16xf32>
    %cst_32 = arith.constant dense<0.000000e+00> : vector<1xf32>
    %81 = vector.multi_reduction <add>, %80, %cst_32 [1, 2] : vector<1x1x16xf32> to vector<1xf32>
    %82 = vector.shape_cast %81 : vector<1xf32> to vector<1x1x1xf32>
    %83 = vector.extract %82[0, 0, 0] : f32 from vector<1x1x1xf32>
    %cst_33 = arith.constant 1.500000e+01 : f32
    %84 = arith.divf %83, %cst_33 : f32
    %85 = math.sqrt %84 : f32
    %cst_34 = arith.constant 0.000000e+00 : f32
    %86 = arith.subf %cst_34, %76 : f32
    %87 = arith.divf %86, %85 : f32
    %c0_35 = arith.constant 0 : index
    %c0_36 = arith.constant 0 : index
    %88 = vector.load %arg2[%c0_35, %c0_36] : memref<1x16xf32, #tpu.memory_space<vmem>>, vector<1x16xf32>
    %89 = vector.shape_cast %88 : vector<1x16xf32> to vector<1x1x16xf32>
    %cst_37 = arith.constant dense<0.000000e+00> : vector<1xf32>
    %90 = vector.multi_reduction <add>, %89, %cst_37 [1, 2] : vector<1x1x16xf32> to vector<1xf32>
    %91 = vector.shape_cast %90 : vector<1xf32> to vector<1x1x1xf32>
    %92 = vector.extract %91[0, 0, 0] : f32 from vector<1x1x1xf32>
    %cst_38 = arith.constant 1.600000e+01 : f32
    %93 = arith.divf %92, %cst_38 : f32
    %94 = vector.broadcast %93 : f32 to vector<1x16xf32>
    %95 = arith.subf %88, %94 : vector<1x16xf32>
    %96 = arith.mulf %78, %95 : vector<1x16xf32>
    %97 = vector.shape_cast %96 : vector<1x16xf32> to vector<1x1x16xf32>
    %cst_39 = arith.constant dense<0.000000e+00> : vector<1xf32>
    %98 = vector.multi_reduction <add>, %97, %cst_39 [1, 2] : vector<1x1x16xf32> to vector<1xf32>
    %99 = vector.shape_cast %98 : vector<1xf32> to vector<1x1x1xf32>
    %100 = vector.extract %99[0, 0, 0] : f32 from vector<1x1x1xf32>
    %101 = math.absf %100 : f32
    %102 = arith.mulf %95, %95 : vector<1x16xf32>
    %103 = vector.shape_cast %102 : vector<1x16xf32> to vector<1x1x16xf32>
    %cst_40 = arith.constant dense<0.000000e+00> : vector<1xf32>
    %104 = vector.multi_reduction <add>, %103, %cst_40 [1, 2] : vector<1x1x16xf32> to vector<1xf32>
    %105 = vector.shape_cast %104 : vector<1xf32> to vector<1x1x1xf32>
    %106 = vector.extract %105[0, 0, 0] : f32 from vector<1x1x1xf32>
    %107 = arith.mulf %83, %106 : f32
    %108 = math.sqrt %107 : f32
    %109 = arith.divf %101, %108 : f32
    %cst_41 = arith.constant 5.000000e-01 : f32
    %110 = arith.mulf %cst_41, %109 : f32
    %cst_42 = arith.constant dense<0.000000e+00> : vector<16xf32>
    %111 = vector.multi_reduction <add>, %53, %cst_42 [0] : vector<4x16xf32> to vector<16xf32>
    %112 = vector.shape_cast %111 : vector<16xf32> to vector<1x16xf32>
    %cst_43 = arith.constant 1.000000e+00 : f32
    %113 = vector.broadcast %cst_43 : f32 to vector<1x16xf32>
    %114 = arith.subf %112, %113 : vector<1x16xf32>
    %115 = math.absf %114 : vector<1x16xf32>
    %116 = vector.shape_cast %115 : vector<1x16xf32> to vector<1x1x16xf32>
    %cst_44 = arith.constant dense<0.000000e+00> : vector<1xf32>
    %117 = vector.multi_reduction <add>, %116, %cst_44 [1, 2] : vector<1x1x16xf32> to vector<1xf32>
    %118 = vector.shape_cast %117 : vector<1xf32> to vector<1x1x1xf32>
    %119 = vector.extract %118[0, 0, 0] : f32 from vector<1x1x1xf32>
    %cst_45 = arith.constant 1.000000e+00 : f32
    %120 = arith.mulf %cst_45, %119 : f32
    %121 = arith.addf %87, %110 : f32
    %122 = arith.addf %121, %120 : f32
    %c0_46 = arith.constant 0 : index
    %c0_47 = arith.constant 0 : index
    %123 = memref.load %arg3[%c0_46, %c0_47] : memref<1x1xf32, #tpu.memory_space<smem>>
    memref.store %122, %arg3[%c0_46, %c0_47] : memref<1x1xf32, #tpu.memory_space<smem>>
    return
  }
}

</mosaic_0001>

<bundles_post_ra>
// kernel: tpu_custom_call.1
= control target key start
LH: loop header
LB: loop body
LE: loop exit
PB: predicated region body
PF: predicated region fallthrough
CT: control target
= control target key end

     0   :  { %8 = vsyncpa [#allocation4], 0  ;;  %s614_s0 = inlined_call_operand.hbm [shape: f32[4,23], index: 0, kind: input, shape index: {}]   ;;  %s615_s1 = inlined_call_operand.hbm [shape: f32[4,16], index: 1, kind: input, shape index: {}]   ;;  %s616_s2 = inlined_call_operand.vmem [shape: f32[1,16], index: 2, kind: input, shape index: {}]   ;;  %s617_s3 = inlined_call_operand.hbm [shape: f32[1,1], index: 3, kind: output, shape index: {}]  }
   0x1   :  { %9 = vsyncpa [#allocation7], 0 }
   0x2   :  { %10 = vsyncpa [#allocation5], 0  ;;  %s475_s12 = smov [#allocation3]   ;;  %s476_s14 = smov [#allocation6]  }
   0x3   :  { %s17_s13 = sshll.u32 %s475_s12, 4  ;;  %s27_s15 = sshll.u32 %s476_s14, 4  ;;  %s18_s13 = int_to_ptr.vmem [resolvable:$true] %s17_s13  ;;  %s28_s15 = int_to_ptr.vmem [resolvable:$true] %s27_s15 }
   0x4   :  { %s415_s18 = scalar_lea.hbm %s614_s0, 64 }
   0x5   :  { %p416_p0 = scmp.ne.s32.totalorder %s614_s0, %s415_s18  ;;  %p419_p1 = scmp.lt.u32.totalorder %s415_s18, %s614_s0 }
   0x7   :  { %p421_p2 = pnand %p419_p1, %p416_p0 }
   0x9   :  { %424 = shalt.err (!%p421_p2)
}
   0xa   :  { %s425_s23 = scalar_lea.vmem %s18_s13, 64  ;;  %p430_p4 = scmp.lt.s32.totalorder %s18_s13, %s18_s13 }
   0xb   :  { %p426_p3 = scmp.ne.s32.totalorder %s18_s13, %s425_s23  ;;  %p431_p5 = scmp.lt.s32.totalorder %s425_s23, %s425_s23 }
   0xd   :  { %p432_p6 = por %p431_p5, %p430_p4 }
   0xf   :  { %p433_p7 = pnand %p432_p6, %p426_p3 }
  0x11   :  { %436 = shalt.err (!%p433_p7)
}
  0x12   :  { %20 = dma.hbm_to_vmem [thread:$0]  %s614_s0, 64, %s18_s13, [#allocation4]  }
  0x13   :  { %s437_s28 = scalar_lea.hbm %s615_s1, 64 }
  0x14   :  { %p438_p8 = scmp.ne.s32.totalorder %s615_s1, %s437_s28  ;;  %p441_p9 = scmp.lt.u32.totalorder %s437_s28, %s615_s1 }
  0x16   :  { %p443_p10 = pnand %p441_p9, %p438_p8 }
  0x18   :  { %446 = shalt.err (!%p443_p10)
}
  0x19   :  { %s447_s6 = scalar_lea.vmem %s28_s15, 64  ;;  %p452_p12 = scmp.lt.s32.totalorder %s28_s15, %s28_s15 }
  0x1a   :  { %p448_p11 = scmp.ne.s32.totalorder %s28_s15, %s447_s6  ;;  %p453_p13 = scmp.lt.s32.totalorder %s447_s6, %s447_s6 }
  0x1c   :  { %p454_p0 = por %p453_p13, %p452_p12 }
  0x1e   :  { %p455_p1 = pnand %p454_p0, %p448_p11 }
  0x20   :  { %458 = shalt.err (!%p455_p1)
}
  0x21   :  { %30 = dma.hbm_to_vmem [thread:$0]  %s615_s1, 64, %s28_s15, [#allocation7]  }
  0x22   :  { %469 = dma.done.wait [#allocation4], 64  }
  0x23   :  { %470 = vsyncadd [#allocation4], 4294967232 }
  0x24   :  { %471 = dma.done.wait [#allocation7], 64  }
  0x25   :  { %472 = vsyncadd [#allocation7], 4294967232  ;;  %v477_v0 = vmov 0.0   ;;  %v39_v1 = vld [vmem:[#allocation3] sm:$0xf]  ;;  %s478_s8 = smov 1  }
  0x26   :  { %40 = vst [vmem:[#allocation2] sm:$0xf] %v477_v0  ;;  %42 = vrot.lane.b32.xlu0 %v39_v1, %s478_s8  ;;  %s479_s9 = smov 127   ;;  %vm52_vm0 = vcmask 175104   ;;  %s480_s1 = smov 4   ;;  %vm70_vm1 = vcmask 15360  }
  0x27   :  { %s481_s10 = smov 2   ;;  %s482_s11 = smov 6   ;;  %vm88_vm2 = vcmask 23552   ;;  %vm106_vm3 = vcmask 31744   ;;  %vm124_vm4 = vcmask 39936   ;;  %vm142_vm5 = vcmask 48128  }
  0x28   :  { %s483_s12 = smov 3   ;;  %s484_s13 = smov 5   ;;  %vm160_vm6 = vcmask 56320   ;;  %vm60_vm7 = vcmask 7168   ;;  %vm191_vm10 = vcmask 125952   ;;  %vm225_vm11 = vcmask 122880  }
  0x29   :  { %s485_s14 = smov 7   ;;  %s486_s15 = smov 126  }
  0x2a   :  { %s487_s16 = smov 125   ;;  %s488_s17 = smov 124  }
  0x2b   :  { %s489_s18 = smov 123   ;;  %s490_s19 = smov 122  }
  0x98   :  { %v43_v2 = vpop.permute.xlu0 %42 }
  0x99   :  { %401 = vrcp.f32 %v43_v2 }
  0xa3   :  { %v402_v3 = vpop.eup %401 }
  0xa4   :  { %v46_v4 = vmul.f32 %v402_v3, %v39_v1 }
  0xa6   :  { %v361_v5 = vadd.f32 -1.0, %v46_v4 }
  0xa8   :  { %49 = vrot.lane.b32.xlu0 %v361_v5, %s479_s9 }
 0x11a   :  { %v50_v6 = vpop.permute.xlu0 %49 }
 0x11b   :  { %53 = vst.msk [vmem:[#allocation2 + $0x4] sm:$0xf] %vm52_vm0, %v50_v6 }
 0x122   :  { %v54_v7 = vld [vmem:[#allocation2] sm:$0xff] }
 0x123   :  { %103 = vrot.lane.b32.xlu0 %v54_v7, %s480_s1  ;;  %67 = vrot.lane.b32.xlu1 %v54_v7, %s481_s10  ;;  %v539_v11 = vld [vmem:[#allocation2 + $0x4] sm:$0xf] }
 0x127   :  { %139 = vrot.lane.b32.xlu0 %v54_v7, %s482_s11  ;;  %85 = vrot.lane.b32.xlu1 %v54_v7, %s483_s12 }
 0x12b   :  { %57 = vrot.lane.b32.xlu0 %v54_v7, %s478_s8  ;;  %121 = vrot.lane.b32.xlu1 %v54_v7, %s484_s13 }
 0x12f   :  { %157 = vrot.lane.b32.xlu1 %v54_v7, %s485_s14 }
 0x195   :  { %v68_v8 = vpop.permute.xlu1 %67  ;;  %v104_v10 = vpop.permute.xlu0 %103 }
 0x196   :  { %v69_v9 = vrot.slane %v68_v8, 4  ;;  %v105_v15 = vrot.slane %v104_v10, 4 }
 0x198   :  { %v71_v12 = vsel %vm70_vm1, %v68_v8, %v69_v9  ;;  %v107_v21 = vsel %vm106_vm3, %v104_v10, %v105_v15 }
 0x199   :  { %v73_v13 = vsub.f32 %v539_v11, %v71_v12  ;;  %v86_v14 = vpop.permute.xlu1 %85  ;;  %v140_v23 = vpop.permute.xlu0 %139  ;;  %v109_v24 = vsub.f32 %v539_v11, %v107_v21 }
 0x19a   :  { %v87_v16 = vrot.slane %v86_v14, 4  ;;  %v141_v26 = vrot.slane %v140_v23, 4 }
 0x19b   :  { %75 = vrot.lane.b32.xlu1 %v73_v13, %s479_s9  ;;  %v79_v20 = vmul.f32 %v73_v13, %v73_v13  ;;  %v115_v30 = vmul.f32 %v109_v24, %v109_v24 }
 0x19c   :  { %v89_v17 = vsel %vm88_vm2, %v86_v14, %v87_v16  ;;  %v143_v31 = vsel %vm142_vm5, %v140_v23, %v141_v26  ;;  %v553_v16 = vld [vmem:[#allocation6] sm:$0xf] }
 0x19d   :  { %v91_v18 = vsub.f32 %v539_v11, %v89_v17  ;;  %v122_v19 = vpop.permute.xlu1 %121  ;;  %v145_v33 = vsub.f32 %v539_v11, %v143_v31  ;;  %v58_v39 = vpop.permute.xlu0 %57 }
 0x19e   :  { %v123_v22 = vrot.slane %v122_v19, 4  ;;  %v59_v41 = vrot.slane %v58_v39, 4 }
 0x19f   :  { %81 = vrot.lane.b32.xlu1 %v79_v20, %s479_s9  ;;  %93 = vrot.lane.b32.xlu0 %v91_v18, %s486_s15  ;;  %v97_v25 = vmul.f32 %v91_v18, %v91_v18  ;;  %v151_v37 = vmul.f32 %v145_v33, %v145_v33 }
 0x1a0   :  { %v125_v27 = vsel %vm124_vm4, %v122_v19, %v123_v22  ;;  %v61_v44 = vsel %vm60_vm7, %v58_v39, %v59_v41 }
 0x1a1   :  { %v158_v28 = vpop.permute.xlu1 %157  ;;  %v127_v29 = vsub.f32 %v539_v11, %v125_v27  ;;  %v63_v47 = vsub.f32 %v539_v11, %v61_v44  ;;  %v568_v44 = vld [vmem:[%s616_s2] sm:$0x1] }
 0x1a2   :  { %v159_v32 = vrot.slane %v158_v28, 4 }
 0x1a3   :  { %111 = vrot.lane.b32.xlu0 %v109_v24, %s487_s16  ;;  %99 = vrot.lane.b32.xlu1 %v97_v25, %s486_s15  ;;  %v133_v34 = vmul.f32 %v127_v29, %v127_v29  ;;  %v65_v52 = vmul.f32 %v63_v47, %v63_v47  ;;  %s459_s15 = scalar_lea.hbm %s617_s3, 16 }
 0x1a4   :  { %v161_v35 = vsel %vm160_vm6, %v158_v28, %v159_v32  ;;  %p460_p2 = scmp.ne.s32.totalorder %s617_s3, %s459_s15  ;;  %p463_p3 = scmp.lt.u32.totalorder %s459_s15, %s617_s3 }
 0x1a5   :  { %v163_v36 = vsub.f32 %v539_v11, %v161_v35 }
 0x1a6   :  { %p465_p4 = pnand %p463_p3, %p460_p2 }
 0x1a7   :  { %117 = vrot.lane.b32.xlu1 %v115_v30, %s487_s16  ;;  %129 = vrot.lane.b32.xlu0 %v127_v29, %s488_s17  ;;  %v169_v38 = vmul.f32 %v163_v36, %v163_v36 }
 0x1ab   :  { %147 = vrot.lane.b32.xlu0 %v145_v33, %s489_s18  ;;  %135 = vrot.lane.b32.xlu1 %v133_v34, %s488_s17 }
 0x1af   :  { %153 = vrot.lane.b32.xlu1 %v151_v37, %s489_s18  ;;  %165 = vrot.lane.b32.xlu0 %v163_v36, %s490_s19 }
 0x1b3   :  { %171 = vrot.lane.b32.xlu0 %v169_v38, %s490_s19 }
 0x20d   :  { %v76_v40 = vpop.permute.xlu1 %75 }
 0x20e   :  { %v78_v48 = vadd.f32 %v76_v40, %v63_v47 }
 0x211   :  { %v94_v42 = vpop.permute.xlu0 %93  ;;  %v82_v43 = vpop.permute.xlu1 %81 }
 0x212   :  { %v96_v51 = vadd.f32 %v94_v42, %v78_v48  ;;  %v84_v53 = vadd.f32 %v82_v43, %v65_v52 }
 0x215   :  { %v112_v45 = vpop.permute.xlu0 %111  ;;  %v100_v46 = vpop.permute.xlu1 %99 }
 0x216   :  { %v114_v54 = vadd.f32 %v112_v45, %v96_v51  ;;  %v102_v57 = vadd.f32 %v100_v46, %v84_v53  ;;  %v270_v45 = vsel %vm225_vm11, %v568_v44, 0.0 }
 0x219   :  { %v130_v49 = vpop.permute.xlu0 %129  ;;  %v118_v50 = vpop.permute.xlu1 %117 }
 0x21a   :  { %v132_v58 = vadd.f32 %v130_v49, %v114_v54  ;;  %v120_v59 = vadd.f32 %v118_v50, %v102_v57 }
 0x21d   :  { %v148_v55 = vpop.permute.xlu0 %147  ;;  %v136_v56 = vpop.permute.xlu1 %135 }
 0x21e   :  { %v150_v60 = vadd.f32 %v148_v55, %v132_v58  ;;  %v138_v63 = vadd.f32 %v136_v56, %v120_v59 }
 0x221   :  { %v166_v61 = vpop.permute.xlu0 %165  ;;  %v154_v62 = vpop.permute.xlu1 %153 }
 0x222   :  { %v168_v0 = vadd.f32 %v166_v61, %v150_v60  ;;  %v156_v2 = vadd.f32 %v154_v62, %v138_v63 }
 0x224   :  { %v175_v1 = vmul.f32 %v168_v0, %v168_v0 }
 0x225   :  { %v172_v3 = vpop.permute.xlu0 %171 }
 0x226   :  { %v176_v4 = vmul.f32 0.125, %v175_v1  ;;  %v174_v5 = vadd.f32 %v172_v3, %v156_v2 }
 0x228   :  { %v177_v6 = vsub.f32 %v174_v5, %v176_v4 }
 0x22a   :  { %v178_v7 = vmul.f32 0.14285715, %v177_v6 }
 0x22c   :  { %403 = vrsqrt.f32 %v178_v7  ;;  %vm181_vm8 = vcmp.eq.f32.partialorder %v178_v7, inf  ;;  %v184_v10 = vand.u32 2147483648, %v178_v7  ;;  %vm183_vm9 = vcmp.eq.f32.partialorder %v178_v7, 0.0 }
 0x236   :  { %v404_v8 = vpop.eup %403 }
 0x237   :  { %v180_v9 = vmul.f32 %v404_v8, %v178_v7 }
 0x239   :  { %v182_v12 = vsel %vm181_vm8, %v178_v7, %v180_v9 }
 0x23a   :  { %v185_v13 = vsel %vm183_vm9, %v184_v10, %v182_v12 }
 0x23b   :  { %v187_v14 = vadd.f32 1e-08, %v185_v13 }
 0x23d   :  { %405 = vrcp.f32 %v187_v14 }
 0x247   :  { %v406_v15 = vpop.eup %405 }
 0x248   :  { %v189_v17 = vmul.f32 0.15, %v406_v15 }
 0x24a   :  { %v190_v18 = vmul.f32 %v189_v17, %v553_v16  ;;  %v323_v17 = vsel %vm191_vm10, %v553_v16, 0.0 }
 0x24c   :  { %192 = vst.msk [vmem:[#allocation2 + $0x4] sm:$0xf] %vm191_vm10, %v190_v18 }
 0x253   :  { %v193_v19 = vld [vmem:[#allocation2] sm:$0xff] }
 0x254   :  { %208 = vrot.lane.b32.xlu1 %v193_v19, %s478_s8  ;;  %v207_v20 = vcombine.high %v193_v19, %v193_v19 }
 0x256   :  { %210 = vrot.lane.b32.xlu0 %v207_v20, %s478_s8 }
 0x258   :  { %195 = vrot.lane.b32.xlu1 %v539_v11, %s490_s19 }
 0x2c6   :  { %v209_v21 = vpop.permute.xlu1 %208 }
 0x2c8   :  { %v211_v22 = vpop.permute.xlu0 %210 }
 0x2c9   :  { %v212_v23 = vsel %vm60_vm7, %v209_v21, %v211_v22 }
 0x2ca   :  { %v214_v24 = vsub.f32 %v190_v18, %v212_v23  ;;  %v196_v25 = vpop.permute.xlu1 %195 }
 0x2cb   :  { %v198_v26 = vmul.f32 %v196_v25, %v190_v18  ;;  %v324_v18 = vrot.slane %v323_v17, 4 }
 0x2cc   :  { %v215_v27 = vand.u32 2147483647, %v214_v24 }
 0x2cd   :  { %v199_v28 = vsel %vm191_vm10, %v198_v26, 0.0  ;;  %v325_v19 = vadd.f32 %v324_v18, %v323_v17 }
 0x2ce   :  { %v216_v29 = vsel %vm191_vm10, %v215_v27, 0.0  ;;  %v200_v30 = vrot.slane %v199_v28, 4 }
 0x2cf   :  { %v217_v31 = vrot.slane %v216_v29, 4  ;;  %v326_v20 = vrot.slane %v325_v19, 2 }
 0x2d0   :  { %v201_v32 = vadd.f32 %v200_v30, %v199_v28 }
 0x2d1   :  { %v218_v33 = vadd.f32 %v217_v31, %v216_v29  ;;  %v327_v21 = vadd.f32 %v326_v20, %v325_v19 }
 0x2d2   :  { %v202_v34 = vrot.slane %v201_v32, 2 }
 0x2d3   :  { %v219_v35 = vrot.slane %v218_v33, 2  ;;  %v328_v22 = vrot.slane %v327_v21, 1 }
 0x2d4   :  { %v203_v36 = vadd.f32 %v202_v34, %v201_v32 }
 0x2d5   :  { %v220_v11 = vadd.f32 %v219_v35, %v218_v33  ;;  %v329_v23 = vadd.f32 %v328_v22, %v327_v21 }
 0x2d6   :  { %v204_v37 = vrot.slane %v203_v36, 1 }
 0x2d7   :  { %v221_v38 = vrot.slane %v220_v11, 1  ;;  %v362_v24 = vadd.f32 -1.0, %v329_v23 }
 0x2d8   :  { %v205_v40 = vadd.f32 %v204_v37, %v203_v36 }
 0x2d9   :  { %v222_v39 = vadd.f32 %v221_v38, %v220_v11  ;;  %v331_v28 = vand.u32 2147483647, %v362_v24 }
 0x2db   :  { %v223_v41 = vmul.f32 0.001, %v222_v39  ;;  %v332_v31 = vsel %vm225_vm11, %v331_v28, 0.0 }
 0x2dd   :  { %v224_v42 = vsub.f32 %v205_v40, %v223_v41 }
 0x2df   :  { %v226_v43 = vsel %vm225_vm11, %v224_v42, 0.0 }
 0x2e0   :  { %227 = vadd.xlane.f32.xlu0 %v226_v43 }
 0x2e4   :  { %271 = vadd.xlane.f32.xlu0 %v270_v45 }
 0x36d   :  { %v228_v46 = vpop.xlane.xlu0 %227 }
 0x36e   :  { %v229_v47 = vrot.slane %v228_v46, 4 }
 0x370   :  { %v230_v48 = vadd.f32 %v229_v47, %v228_v46 }
 0x371   :  { %v272_v6 = vpop.xlane.xlu0 %271 }
 0x372   :  { %v231_v49 = vrot.slane %v230_v48, 2  ;;  %v273_v7 = vrot.slane %v272_v6, 4 }
 0x374   :  { %v232_v50 = vadd.f32 %v231_v49, %v230_v48  ;;  %v274_v8 = vadd.f32 %v273_v7, %v272_v6 }
 0x376   :  { %v233_v51 = vrot.slane %v232_v50, 1  ;;  %v275_v9 = vrot.slane %v274_v8, 2 }
 0x378   :  { %v234_v52 = vadd.f32 %v233_v51, %v232_v50  ;;  %v276_v12 = vadd.f32 %v275_v9, %v274_v8 }
 0x37a   :  { %363 = vpush %v234_v52  ;;  %v277_v13 = vrot.slane %v276_v12, 1 }
 0x37c   :  { %v278_v15 = vadd.f32 %v277_v13, %v276_v12 }
 0x3ab   :  { %s572_s22 = spop %363 }
 0x3ac   :  { %s238_s23 = smul.f32 0.0625, %s572_s22 }
 0x3ae   :  { %v239_v53 = vstv %s238_s23  ;;  %s585_s26 = ssub.f32 0.0, %s238_s23 }
 0x3af   :  { %v240_v54 = vsub.f32 %v224_v42, %v239_v53 }
 0x3b1   :  { %v241_v55 = vmul.f32 %v240_v54, %v240_v54 }
 0x3b3   :  { %v242_v56 = vsel %vm225_vm11, %v241_v55, 0.0 }
 0x3b4   :  { %243 = vadd.xlane.f32.xlu1 %v242_v56 }
 0x441   :  { %v244_v57 = vpop.xlane.xlu1 %243 }
 0x442   :  { %v245_v58 = vrot.slane %v244_v57, 4 }
 0x444   :  { %v246_v59 = vadd.f32 %v245_v58, %v244_v57 }
 0x446   :  { %v247_v60 = vrot.slane %v246_v59, 2 }
 0x448   :  { %v248_v61 = vadd.f32 %v247_v60, %v246_v59 }
 0x44a   :  { %v249_v62 = vrot.slane %v248_v61, 1 }
 0x44c   :  { %v250_v63 = vadd.f32 %v249_v62, %v248_v61 }
 0x44e   :  { %365 = vpush %v250_v63 }
 0x47f   :  { %s578_s2 = spop %365 }
 0x480   :  { %s254_s24 = smul.f32 0.06666667, %s578_s2 }
 0x482   :  { %v255_v0 = vstv %s254_s24 }
 0x483   :  { %407 = vrsqrt.f32 %v255_v0  ;;  %vm258_vm12 = vcmp.eq.f32.partialorder %v255_v0, inf  ;;  %v261_v3 = vand.u32 2147483648, %v255_v0  ;;  %vm260_vm13 = vcmp.eq.f32.partialorder %v255_v0, 0.0 }
 0x48d   :  { %v408_v1 = vpop.eup %407 }
 0x48e   :  { %v257_v2 = vmul.f32 %v408_v1, %v255_v0 }
 0x490   :  { %v259_v4 = vsel %vm258_vm12, %v255_v0, %v257_v2 }
 0x491   :  { %v262_v5 = vsel %vm260_vm13, %v261_v3, %v259_v4 }
 0x492   :  { %367 = vpush %v262_v5 }
 0x4c3   :  { %s368_s25 = spop %367 }
 0x4c4   :  { %v265_v10 = vstv %s368_s25 }
 0x4c5   :  { %409 = vrcp.f32 %v265_v10 }
 0x4cf   :  { %v410_v14 = vpop.eup %409 }
 0x4d0   :  { %369 = vpush %v410_v14 }
 0x4d1   :  { %371 = vpush %v278_v15 }
 0x501   :  { %s587_s27 = spop %369 }
 0x502   :  { %s268_s28 = smul.f32 %s587_s27, %s585_s26  ;;  %s372_s29 = spop %371 }
 0x503   :  { %s282_s30 = smul.f32 0.0625, %s372_s29 }
 0x505   :  { %v283_v25 = vstv %s282_s30 }
 0x506   :  { %v284_v16 = vsub.f32 %v568_v44, %v283_v25 }
 0x508   :  { %v297_v26 = vmul.f32 %v284_v16, %v284_v16  ;;  %v285_v27 = vmul.f32 %v284_v16, %v240_v54 }
 0x50a   :  { %v298_v29 = vsel %vm225_vm11, %v297_v26, 0.0  ;;  %v286_v30 = vsel %vm225_vm11, %v285_v27, 0.0 }
 0x50b   :  { %299 = vadd.xlane.f32.xlu1 %v298_v29  ;;  %287 = vadd.xlane.f32.xlu0 %v286_v30 }
 0x50f   :  { %333 = vadd.xlane.f32.xlu0 %v332_v31 }
 0x598   :  { %v300_v32 = vpop.xlane.xlu1 %299  ;;  %v288_v33 = vpop.xlane.xlu0 %287 }
 0x599   :  { %v301_v34 = vrot.slane %v300_v32, 4  ;;  %v289_v35 = vrot.slane %v288_v33, 4 }
 0x59b   :  { %v302_v36 = vadd.f32 %v301_v34, %v300_v32  ;;  %v290_v11 = vadd.f32 %v289_v35, %v288_v33 }
 0x59c   :  { %v334_v51 = vpop.xlane.xlu0 %333 }
 0x59d   :  { %v303_v37 = vrot.slane %v302_v36, 2  ;;  %v291_v38 = vrot.slane %v290_v11, 2  ;;  %v335_v52 = vrot.slane %v334_v51, 4 }
 0x59f   :  { %v304_v39 = vadd.f32 %v303_v37, %v302_v36  ;;  %v292_v40 = vadd.f32 %v291_v38, %v290_v11  ;;  %v336_v53 = vadd.f32 %v335_v52, %v334_v51 }
 0x5a1   :  { %v293_v41 = vrot.slane %v292_v40, 1  ;;  %v305_v42 = vrot.slane %v304_v39, 1  ;;  %v337_v54 = vrot.slane %v336_v53, 2 }
 0x5a3   :  { %v294_v43 = vadd.f32 %v293_v41, %v292_v40  ;;  %v306_v44 = vadd.f32 %v305_v42, %v304_v39  ;;  %v338_v56 = vadd.f32 %v337_v54, %v336_v53 }
 0x5a5   :  { %373 = vpush %v294_v43  ;;  %v339_v57 = vrot.slane %v338_v56, 1 }
 0x5a6   :  { %375 = vpush %v306_v44 }
 0x5a7   :  { %v340_v58 = vadd.f32 %v339_v57, %v338_v56 }
 0x5d6   :  { %s595_s4 = spop %373 }
 0x5d7   :  { %s376_s5 = spop %375  ;;  %s296_s7 = sand.u32 2147483647, %s595_s4 }
 0x5d8   :  { %s308_s6 = smul.f32 %s376_s5, %s578_s2 }
 0x5da   :  { %v309_v45 = vstv %s308_s6 }
 0x5db   :  { %411 = vrsqrt.f32 %v309_v45  ;;  %vm312_vm14 = vcmp.eq.f32.partialorder %v309_v45, inf  ;;  %v315_v48 = vand.u32 2147483648, %v309_v45  ;;  %vm314_vm15 = vcmp.eq.f32.partialorder %v309_v45, 0.0 }
 0x5e5   :  { %v412_v46 = vpop.eup %411 }
 0x5e6   :  { %v311_v47 = vmul.f32 %v412_v46, %v309_v45 }
 0x5e8   :  { %v313_v49 = vsel %vm312_vm14, %v309_v45, %v311_v47 }
 0x5e9   :  { %v316_v50 = vsel %vm314_vm15, %v315_v48, %v313_v49 }
 0x5ea   :  { %377 = vpush %v316_v50 }
 0x61b   :  { %s378_s0 = spop %377 }
 0x61c   :  { %v318_v55 = vstv %s378_s0 }
 0x61d   :  { %413 = vrcp.f32 %v318_v55 }
 0x627   :  { %v414_v59 = vpop.eup %413 }
 0x628   :  { %379 = vpush %v414_v59 }
 0x629   :  { %381 = vpush %v340_v58 }
 0x659   :  { %s380_s8 = spop %379 }
 0x65a   :  { %s321_s9 = smul.f32 %s380_s8, %s296_s7  ;;  %s382_s11 = spop %381 }
 0x65c   :  { %s322_s1 = smul.f32 0.5, %s321_s9 }
 0x65e   :  { %s342_s10 = sadd.f32 %s322_s1, %s268_s28 }
 0x660   :  { %s343_s12 = sadd.f32 %s382_s11, %s342_s10 }
 0x662   :  { %345 = sst [smem:[#allocation8]] %s343_s12 }
 0x663   :  { %468 = shalt.err (!%p465_p4)
}
 0x664   :  { %s491_s20 = smov [#allocation8]  }
 0x665   :  { %353 = dma.smem_to_hbm %s491_s20, 16, %s617_s3, [#allocation5]  }
 0x666   :  { %473 = dma.done.wait [#allocation5], 16  }
 0x667   :  { %474 = vsyncadd [#allocation5], 4294967280 }
 0x668   :  { %357 = sfence }
 0x669   :  { %358 = vsyncpa [#allocation4], 1 }
 0x66a   :  { %359 = vsyncpa [#allocation7], 1 }
 0x66b   :  { %360 = vsyncpa [#allocation5], 1 }

</bundles_post_ra>
